<compile_context>
chip_gen: v5e
topology: v5e:2x2
jax: 0.10.0
libtpu: 0.0.40
codegen_flags: <defaults>
</compile_context>

<pallas_src>
import functools

import jax
import jax.numpy as jnp
from jax import lax
from jax.experimental import pallas as pl
from jax.experimental.pallas import tpu as pltpu


_MAX_BLOCK_ROWS = 4096          # sanity cap on the row tile
_DEFAULT_BLOCK_BYTES = 1 << 20  # ~1 MiB: ~85% of HBM roofline on v5e/v6e
_V7X_BLOCK_BYTES = 4 << 20      # v7x: faster per-TC HBM -> bigger blocks to
                                # amortize the fixed ~0.35us per-grid-step cost


def _sublane_pack(itemsize):
    # rows per vreg: 8 (32-bit), 16 (16-bit), 32 (8-bit)
    return {4: 8, 2: 16, 1: 32}.get(itemsize, 8)


def _round_up(a, b):
    return ((a + b - 1) // b) * b


def _chip_params():
    """(target block bytes, prefer-even parallel split) gated on chip kind."""
    target_bytes = _DEFAULT_BLOCK_BYTES
    prefer_even = False
    try:
        kind = jax.devices()[0].device_kind.lower()
    except Exception:  # pragma: no cover - be robust to odd backends
        kind = ""
    if "v7" in kind:  # v7x: 2 TCs per chip, ~1.6 TB/s HBM per TC
        target_bytes = _V7X_BLOCK_BYTES
        prefer_even = True
    return target_bytes, prefer_even


def _choose_tiles(R, HW, itemsize, target_bytes, prefer_even):
    """Pick (TR, THW): row tile and lane tile for reducing an (R, HW) array."""
    pack = _sublane_pack(itemsize)
    lane_pad = _round_up(HW, 128)
    row_bytes = lane_pad * itemsize  # VMEM footprint per row (padded lanes)

    if row_bytes * pack > target_bytes:
        # Even one pack-high stripe of the full H*W busts the budget: keep the
        # row tile minimal and split H*W onto the reduction grid axis with
        # bounded, 128-multiple lane tiles (ragged tail masked in-kernel).
        TR = pack if R >= pack else R
        max_lanes = max(128, (target_bytes // (max(TR, 1) * itemsize)) // 128 * 128)
        divs = [w for w in range(128, min(lane_pad, max_lanes) + 1, 128)
                if HW % w == 0]
        THW = max(divs) if divs else min(max_lanes, lane_pad - 128 if lane_pad > 128 else 128)
        THW = max(128, THW)
        return TR, THW

    # Full H*W fits per stripe: lane tile is the whole reduction axis and the
    # row tile is sized from the byte budget (padded-lane accounting).
    THW = HW
    budget_rows = (target_bytes // row_bytes) // pack * pack
    tr_cap = min(_MAX_BLOCK_ROWS, max(pack, budget_rows))

    if R <= pack:
        return R, THW  # full row dim is always a legal block

    divs = [d for d in range(pack, min(R, tr_cap) + 1, pack) if R % d == 0]
    if divs:
        if prefer_even:
            # v7x: prefer an even number of row blocks so the two TensorCores
            # get balanced work on the "parallel" axis.
            even = [d for d in divs if (R // d) % 2 == 0]
            pool = even if even else divs
        else:
            pool = divs
        TR = max(pool)
    else:
        # No pack-multiple divisor of R within the cap: take the largest pack
        # multiple that fits; the ragged trailing row block (cdiv grid) only
        # produces garbage rows that the output never exposes.
        TR = (min(R, tr_cap) // pack) * pack
    return TR, THW


def _avgpool_kernel(x_ref, o_ref, acc_ref, *, inv_hw, hw, thw, ragged):
    # Grid = (row blocks ["parallel"], H*W chunks ["arbitrary" reduction]).
    # x_ref: (TR, THW) lane-dense rows; o_ref: (TR, 1); acc_ref: (TR, 1) f32.
    j = pl.program_id(1)

    @pl.when(j == 0)
    def _init():
        acc_ref[...] = jnp.zeros_like(acc_ref)

    x = x_ref[...]
    if ragged:
        # Last lane chunk extends past H*W: zero the out-of-range lanes.
        valid = hw - j * thw
        lane = lax.broadcasted_iota(jnp.int32, x.shape, 1)
        x = jnp.where(lane < valid, x, jnp.zeros_like(x))

    # Reduce only along the lane-dense last axis of this block; the f32
    # accumulation dtype folds the cast into the reduction (no f32 copy of the
    # whole tile is materialized).
    acc_ref[...] += jnp.sum(x, axis=-1, keepdims=True, dtype=jnp.float32)

    @pl.when(j == pl.num_programs(1) - 1)
    def _finalize():
        o_ref[...] = (acc_ref[...] * inv_hw).astype(o_ref.dtype)


def avg_pool(x):
    """AdaptiveAvgPool2d(1) followed by flatten: (N, C, H, W) -> (N, C)."""
    N, C, H, W = x.shape
    R, HW = N * C, H * W
    itemsize = jnp.dtype(x.dtype).itemsize

    # Free relayout for a contiguous NCHW tensor: N*C rows of H*W elements,
    # putting the reduction axis on lanes.
    x2 = x.reshape(R, HW)

    target_bytes, prefer_even = _chip_params()
    TR, THW = _choose_tiles(R, HW, itemsize, target_bytes, prefer_even)

    grid = (pl.cdiv(R, TR), pl.cdiv(HW, THW))
    ragged = (HW % THW) != 0

    kernel = functools.partial(_avgpool_kernel, inv_hw=1.0 / HW,
                               hw=HW, thw=THW, ragged=ragged)

    out = pl.pallas_call(
        kernel,
        out_shape=jax.ShapeDtypeStruct((R, 1), x.dtype),
        grid=grid,
        in_specs=[pl.BlockSpec((TR, THW), lambda i, j: (i, j))],
        # Output block is resident across the reduction axis j (index map
        # ignores j); it is only written on the final j step.
        out_specs=pl.BlockSpec((TR, 1), lambda i, j: (i, 0)),
        scratch_shapes=[pltpu.VMEM((TR, 1), jnp.float32)],
        compiler_params=pltpu.CompilerParams(
            dimension_semantics=("parallel", "arbitrary")),
        cost_estimate=pl.CostEstimate(
            flops=int(R) * int(HW),
            transcendentals=0,
            bytes_accessed=int(R) * int(HW) * int(itemsize) + int(R) * int(itemsize)),
    )(x2)

    return out.reshape(N, C)


if __name__ == "__main__":
    key = jax.random.PRNGKey(0)

    # Small NCHW input consistent with the module's forward.
    x = jax.random.normal(key, (2, 4, 16, 16), dtype=jnp.float32)
    out = avg_pool(x)
    jax.block_until_ready(out)
    ref = jnp.mean(x, axis=(2, 3))
    assert out.shape == (2, 4), out.shape
    assert jnp.allclose(out, ref, atol=1e-5, rtol=1e-5), "mismatch vs reference"

    # Extra tiny check on a pack-unfriendly shape (R < sublane pack, HW not a
    # multiple of 128) to exercise the full-dim block path.
    x2 = jax.random.normal(jax.random.PRNGKey(1), (2, 3, 7, 7), dtype=jnp.float32)
    out2 = avg_pool(x2)
    jax.block_until_ready(out2)
    ref2 = jnp.mean(x2, axis=(2, 3))
    assert out2.shape == (2, 3), out2.shape
    assert jnp.allclose(out2, ref2, atol=1e-5, rtol=1e-5), "mismatch vs reference (odd shape)"

    print("KERNEL_OK")
</pallas_src>

<mosaic_0001>
module attributes {stable_mosaic.version = 11 : i64} {
  func.func @_avgpool_kernel(%arg0: i32, %arg1: i32, %arg2: memref<8x256xf32, #tpu.memory_space<vmem>>, %arg3: memref<8x1xf32, #tpu.memory_space<vmem>>, %arg4: memref<8x1xf32, #tpu.memory_space<vmem>>) attributes {dimension_semantics = [#tpu.dimension_semantics<parallel>, #tpu.dimension_semantics<arbitrary>], iteration_bounds = array<i64: 1, 1>, scalar_prefetch = 0 : i64, scratch_operands = 1 : i64, tpu.core_type = #tpu.core_type<tc>, window_params = [{transform_indices = @transform_0, window_bounds = array<i64: 8, 256>}, {transform_indices = @transform_1, window_bounds = array<i64: 8, 1>}]} {
    %c0_i32 = arith.constant 0 : i32
    %0 = arith.cmpi eq, %arg1, %c0_i32 : i32
    %1 = arith.extui %0 : i1 to i32
    %c0_i32_0 = arith.constant 0 : i32
    %2 = arith.cmpi ne, %1, %c0_i32_0 : i32
    scf.if %2 {
      %cst_8 = arith.constant 0.000000e+00 : f32
      %12 = vector.broadcast %cst_8 : f32 to vector<8x1xf32>
      %c0_9 = arith.constant 0 : index
      %c0_10 = arith.constant 0 : index
      %13 = vector.load %arg4[%c0_9, %c0_10] : memref<8x1xf32, #tpu.memory_space<vmem>>, vector<8x1xf32>
      tpu.vector_store %arg4[%c0_9, %c0_10], %12 {strides = array<i32>} : memref<8x1xf32, #tpu.memory_space<vmem>>, vector<8x1xf32>,
    } else {
    }
    %c0 = arith.constant 0 : index
    %c0_1 = arith.constant 0 : index
    %3 = vector.load %arg2[%c0, %c0_1] : memref<8x256xf32, #tpu.memory_space<vmem>>, vector<8x256xf32>
    %c0_2 = arith.constant 0 : index
    %c0_3 = arith.constant 0 : index
    %4 = vector.load %arg4[%c0_2, %c0_3] : memref<8x1xf32, #tpu.memory_space<vmem>>, vector<8x1xf32>
    %cst = arith.constant dense<0.000000e+00> : vector<8xf32>
    %5 = vector.multi_reduction <add>, %3, %cst [1] : vector<8x256xf32> to vector<8xf32>
    %6 = vector.shape_cast %5 : vector<8xf32> to vector<8x1xf32>
    %7 = arith.addf %4, %6 : vector<8x1xf32>
    %c0_4 = arith.constant 0 : index
    %c0_5 = arith.constant 0 : index
    %8 = vector.load %arg4[%c0_4, %c0_5] : memref<8x1xf32, #tpu.memory_space<vmem>>, vector<8x1xf32>
    tpu.vector_store %arg4[%c0_4, %c0_5], %7 {strides = array<i32>} : memref<8x1xf32, #tpu.memory_space<vmem>>, vector<8x1xf32>,
    %c0_i32_6 = arith.constant 0 : i32
    %9 = arith.cmpi eq, %arg1, %c0_i32_6 : i32
    %10 = arith.extui %9 : i1 to i32
    %c0_i32_7 = arith.constant 0 : i32
    %11 = arith.cmpi ne, %10, %c0_i32_7 : i32
    scf.if %11 {
      %c0_8 = arith.constant 0 : index
      %c0_9 = arith.constant 0 : index
      %12 = vector.load %arg4[%c0_8, %c0_9] : memref<8x1xf32, #tpu.memory_space<vmem>>, vector<8x1xf32>
      %cst_10 = arith.constant 3.906250e-03 : f32
      %13 = vector.broadcast %cst_10 : f32 to vector<8x1xf32>
      %14 = arith.mulf %12, %13 : vector<8x1xf32>
      %c0_11 = arith.constant 0 : index
      %c0_12 = arith.constant 0 : index
      %15 = vector.load %arg3[%c0_11, %c0_12] : memref<8x1xf32, #tpu.memory_space<vmem>>, vector<8x1xf32>
      tpu.vector_store %arg3[%c0_11, %c0_12], %14 {strides = array<i32>} : memref<8x1xf32, #tpu.memory_space<vmem>>, vector<8x1xf32>,
    } else {
    }
    return
  }
  func.func @transform_0(%arg0: i32, %arg1: i32) -> (i32, i32) {
    %c0_i32 = arith.constant 0 : i32
    return %arg0, %arg1 : i32, i32
  }
  func.func @transform_1(%arg0: i32, %arg1: i32) -> (i32, i32) {
    %c0_i32 = arith.constant 0 : i32
    %c0_i32_0 = arith.constant 0 : i32
    return %arg0, %c0_i32 : i32, i32
  }
}

</mosaic_0001>

<bundles_post_ra>
// kernel: tpu_custom_call.1
= control target key start
LH: loop header
LB: loop body
LE: loop exit
PB: predicated region body
PF: predicated region fallthrough
CT: control target
= control target key end

     0   :  { %6 = vsyncpa [#allocation4], 0  ;;  %s76_s9 = smov [#allocation3]   ;;  %s94_s0 = inlined_call_operand.hbm [shape: f32[8,256], index: 0, kind: input, shape index: {}]   ;;  %s95_s1 = inlined_call_operand.vmem [shape: f32[8,1], index: 1, kind: output, shape index: {}]  }
   0x1   :  { %s12_s8 = sshll.u32 %s94_s0, 4  ;;  %s14_s10 = sshll.u32 %s76_s9, 4  ;;  %s13_s8 = int_to_ptr.hbm [resolvable:$true] %s12_s8  ;;  %s15_s10 = int_to_ptr.vmem [resolvable:$true] %s14_s10 }
   0x2   :  { %17 = dma.hbm_to_vmem [thread:$0]  %s13_s8, 256, %s15_s10, [#allocation4]  }
   0x3   :  { %74 = dma.done.wait [#allocation4], 256  }
   0x4   :  { %75 = vsyncadd [#allocation4], 4294967040  ;;  %vm26_vm0 = vcmask 7168   ;;  %v77_v0 = vmov 0.0   ;;  %v28_v1 = vld [vmem:[#allocation3] sm:$0xff]  ;;  %v29_v2 = vld [vmem:[#allocation3 + $0x8] sm:$0xff] }
   0x5   :  { %27 = vst.msk [vmem:[#allocation2] sm:$0xff] %vm26_vm0, %v77_v0  ;;  %v31_v3 = vadd.f32 %v29_v2, %v28_v1 }
   0x7   :  { %32 = vadd.xlane.f32.xlu0 %v31_v3 }
   0xc   :  { %v30_v4 = vld [vmem:[#allocation2] sm:$0xff] }
  0x7a   :  { %v33_v5 = vpop.xlane.xlu0 %32 }
  0x7b   :  { %v34_v6 = vadd.f32 %v33_v5, %v30_v4 }
  0x7d   :  { %36 = vst.msk [vmem:[#allocation2] sm:$0xff] %vm26_vm0, %v34_v6 }
  0x84   :  { %v40_v7 = vld [vmem:[#allocation2] sm:$0xff] }
  0x85   :  { %v41_v8 = vmul.f32 0.00390625, %v40_v7 }
  0x87   :  { %42 = vst.msk [vmem:[%s95_s1] sm:$0xff] %vm26_vm0, %v41_v8 }
  0x88   :  { %47 = vsyncpa [#allocation4], 1 }

</bundles_post_ra>
